<compile_context>
chip_gen: v5e
topology: v5e:2x2
jax: 0.10.0
libtpu: 0.0.40
codegen_flags: <defaults>
</compile_context>

<pallas_src>
import jax
import jax.numpy as jnp
from jax.experimental import pallas as pl
from jax.experimental.pallas import tpu as pltpu


def _linear_kernel(x_ref, wt_ref, b_ref, o_ref):
    # x_ref:  (B, D)      full embedding rows (resident every step)
    # wt_ref: (D, TN)     tile of transposed Linear weight (streamed)
    # b_ref:  (1, TN)     tile of bias
    # o_ref:  (B, TN)     tile of output rows
    x = x_ref[...].astype(wt_ref.dtype)          # engage bf16 MXU path when Wt is bf16
    acc = jnp.dot(x, wt_ref[...], preferred_element_type=jnp.float32)
    o_ref[...] = (acc + b_ref[...].astype(jnp.float32)).astype(o_ref.dtype)


def _choose_tile_n(D, n128, wt_itemsize, *,
                   target_tile_bytes=8 << 20,   # ~8 MiB of Wt per grid step
                   min_tile_bytes=1 << 20,      # don't shrink below ~1 MiB/step
                   min_grid_steps=8):           # keep both v7x TCs busy
    per_col_bytes = D * wt_itemsize
    max_cols = max(128, (target_tile_bytes // per_col_bytes) // 128 * 128)
    tile_n = min(n128, max_cols)
    if pl.cdiv(n128, tile_n) < min_grid_steps:
        cand = (n128 // min_grid_steps) // 128 * 128
        if cand >= 128 and cand * per_col_bytes >= min_tile_bytes:
            tile_n = cand
    return tile_n


def _hypernet_linear(x, wt, bias):
    """x: (B, D); wt: (D, N); bias: (N,)  ->  (B, N) f32."""
    B, D = x.shape
    N = wt.shape[1]
    assert wt.shape == (D, N) and bias.shape == (N,)

    wt_itemsize = jnp.dtype(wt.dtype).itemsize
    b_itemsize = jnp.dtype(bias.dtype).itemsize

    # Pad N up to a lane multiple, pick tile, then pad to a tile multiple.
    n128 = pl.cdiv(N, 128) * 128
    tile_n = _choose_tile_n(D, n128, wt_itemsize)
    grid_n = pl.cdiv(n128, tile_n)
    n_pad = grid_n * tile_n

    if n_pad != N:
        wt = jnp.pad(wt, ((0, 0), (0, n_pad - N)))
        bias = jnp.pad(bias, (0, n_pad - N))
    bias2d = bias.reshape(1, n_pad)

    # Explicit VMEM budget: double-buffered Wt tile + bias + out + x + slack.
    vmem_bytes = (2 * D * tile_n * wt_itemsize
                  + 2 * tile_n * b_itemsize
                  + 2 * B * tile_n * 4
                  + 2 * B * D * 4
                  + (1 << 20))
    vmem_limit = max(vmem_bytes, 32 << 20)   # safe on v5e/v6e (128 MiB) and v7x (64 MiB)

    out = pl.pallas_call(
        _linear_kernel,
        out_shape=jax.ShapeDtypeStruct((B, n_pad), jnp.float32),
        grid_spec=pltpu.PrefetchScalarGridSpec(
            num_scalar_prefetch=0,
            grid=(grid_n,),
            in_specs=[
                pl.BlockSpec((B, D), lambda j: (0, 0)),        # embeddings (resident)
                pl.BlockSpec((D, tile_n), lambda j: (0, j)),   # Wt tile (streamed)
                pl.BlockSpec((1, tile_n), lambda j: (0, j)),   # bias tile
            ],
            out_specs=pl.BlockSpec((B, tile_n), lambda j: (0, j)),
        ),
        compiler_params=pltpu.CompilerParams(
            dimension_semantics=("parallel",),
            vmem_limit_bytes=int(vmem_limit),
        ),
    )(x, wt, bias2d)

    return out[:, :N]


def lora_layers_hypernet_forward(embeddings, wt, bias, input_dim, output_dim):
    """Module-faithful forward.

    embeddings: (D,) f32
    wt:         (D, N) — Linear weight stored transposed; f32 or bf16
    bias:       (N,)   with N = input_dim * output_dim
    returns     (input_dim, output_dim) f32
    """
    D = embeddings.shape[0]
    N = input_dim * output_dim
    assert wt.shape == (D, N) and bias.shape == (N,)
    out = _hypernet_linear(embeddings.reshape(1, D), wt, bias)
    return out.reshape(input_dim, output_dim)


if __name__ == "__main__":
    # Small, module-consistent shapes. N = 192 is deliberately NOT a multiple
    # of 128 to exercise the pad-and-slice path.
    projected_task_embedding_dim = 64   # config.projected_task_embedding_dim
    input_dim = 8                       # e.g. LoRA rank
    output_dim = 24                     # e.g. model hidden slice
    N = input_dim * output_dim          # 192

    key = jax.random.PRNGKey(0)
    k_emb, k_w, k_b = jax.random.split(key, 3)

    # Deterministic init mimicking nn.Linear default (uniform +-1/sqrt(fan_in)).
    bound = 1.0 / jnp.sqrt(projected_task_embedding_dim)
    wt = jax.random.uniform(k_w, (projected_task_embedding_dim, N),
                            minval=-bound, maxval=bound, dtype=jnp.float32)
    bias = jax.random.uniform(k_b, (N,), minval=-bound, maxval=bound,
                              dtype=jnp.float32)
    embeddings = jax.random.normal(k_emb, (projected_task_embedding_dim,),
                                   dtype=jnp.float32)

    # Reference (same math as the PyTorch forward).
    ref = (embeddings @ wt + bias).reshape(input_dim, output_dim)

    # f32 weight path: exact match.
    weight = lora_layers_hypernet_forward(embeddings, wt, bias,
                                          input_dim, output_dim)
    weight = jax.block_until_ready(weight)
    assert weight.shape == (input_dim, output_dim)
    assert jnp.allclose(weight, ref, atol=1e-5, rtol=1e-5)

    # bf16-streamed weight path (halves HBM traffic; f32 accumulation).
    weight_bf16 = lora_layers_hypernet_forward(embeddings,
                                               wt.astype(jnp.bfloat16),
                                               bias, input_dim, output_dim)
    weight_bf16 = jax.block_until_ready(weight_bf16)
    assert weight_bf16.shape == (input_dim, output_dim)
    assert jnp.allclose(weight_bf16, ref, atol=5e-2, rtol=5e-2)

    print("KERNEL_OK")
</pallas_src>

<mosaic_0001>
module attributes {stable_mosaic.version = 11 : i64} {
  func.func @_linear_kernel(%arg0: i32, %arg1: memref<1x64xf32, #tpu.memory_space<vmem>>, %arg2: memref<64x256xf32, #tpu.memory_space<vmem>>, %arg3: memref<1x256xf32, #tpu.memory_space<vmem>>, %arg4: memref<1x256xf32, #tpu.memory_space<vmem>>) attributes {dimension_semantics = [#tpu.dimension_semantics<parallel>], iteration_bounds = array<i64: 1>, scalar_prefetch = 0 : i64, scratch_operands = 0 : i64, tpu.core_type = #tpu.core_type<tc>, window_params = [{pipeline_mode = #tpu.pipeline_mode<synchronous>, transform_indices = @transform_0, window_bounds = array<i64: 1, 64>}, {transform_indices = @transform_1, window_bounds = array<i64: 64, 256>}, {transform_indices = @transform_2, window_bounds = array<i64: 1, 256>}, {transform_indices = @transform_3, window_bounds = array<i64: 1, 256>}]} {
    %c0 = arith.constant 0 : index
    %c0_0 = arith.constant 0 : index
    %0 = vector.load %arg1[%c0, %c0_0] : memref<1x64xf32, #tpu.memory_space<vmem>>, vector<1x64xf32>
    %c0_1 = arith.constant 0 : index
    %c0_2 = arith.constant 0 : index
    %1 = vector.load %arg2[%c0_1, %c0_2] : memref<64x256xf32, #tpu.memory_space<vmem>>, vector<64x256xf32>
    %cst = arith.constant dense<0.000000e+00> : vector<1x256xf32>
    %2 = tpu.matmul %0, %1, %cst {dimension_numbers = #tpu.dot_dimension_numbers<[1], [0], [0], [1], [0, 0, 1, 1], [], []>} : vector<1x64xf32>, vector<64x256xf32>, vector<1x256xf32> -> vector<1x256xf32>
    %c0_3 = arith.constant 0 : index
    %c0_4 = arith.constant 0 : index
    %3 = vector.load %arg3[%c0_3, %c0_4] : memref<1x256xf32, #tpu.memory_space<vmem>>, vector<1x256xf32>
    %4 = arith.addf %2, %3 : vector<1x256xf32>
    %c0_5 = arith.constant 0 : index
    %c0_6 = arith.constant 0 : index
    %5 = vector.load %arg4[%c0_5, %c0_6] : memref<1x256xf32, #tpu.memory_space<vmem>>, vector<1x256xf32>
    tpu.vector_store %arg4[%c0_5, %c0_6], %4 {strides = array<i32>} : memref<1x256xf32, #tpu.memory_space<vmem>>, vector<1x256xf32>,
    return
  }
  func.func @transform_0(%arg0: i32) -> (i32, i32) {
    %c0_i32 = arith.constant 0 : i32
    %c0_i32_0 = arith.constant 0 : i32
    %c0_i32_1 = arith.constant 0 : i32
    return %c0_i32, %c0_i32_0 : i32, i32
  }
  func.func @transform_1(%arg0: i32) -> (i32, i32) {
    %c0_i32 = arith.constant 0 : i32
    %c0_i32_0 = arith.constant 0 : i32
    return %c0_i32, %arg0 : i32, i32
  }
  func.func @transform_2(%arg0: i32) -> (i32, i32) {
    %c0_i32 = arith.constant 0 : i32
    %c0_i32_0 = arith.constant 0 : i32
    return %c0_i32, %arg0 : i32, i32
  }
  func.func @transform_3(%arg0: i32) -> (i32, i32) {
    %c0_i32 = arith.constant 0 : i32
    %c0_i32_0 = arith.constant 0 : i32
    return %c0_i32, %arg0 : i32, i32
  }
}

</mosaic_0001>

<bundles_post_ra>
// kernel: tpu_custom_call.1
= control target key start
LH: loop header
LB: loop body
LE: loop exit
PB: predicated region body
PF: predicated region fallthrough
CT: control target
= control target key end

     0   :  { %8 = vsyncpa [#allocation3], 0  ;;  %s302_s0 = inlined_call_operand.hbm [shape: f32[1,64], index: 0, kind: input, shape index: {}]   ;;  %s303_s1 = inlined_call_operand.hbm [shape: f32[64,256], index: 1, kind: input, shape index: {}]   ;;  %s304_s2 = inlined_call_operand.hbm [shape: f32[1,256], index: 2, kind: input, shape index: {}]   ;;  %s305_s3 = inlined_call_operand.hbm [shape: f32[1,256], index: 3, kind: output, shape index: {}]  }
   0x1   :  { %9 = vsyncpa [#allocation6], 0  ;;  %s26_s14 = sshll.u32 %s303_s1, 4  ;;  %s27_s14 = int_to_ptr.hbm [resolvable:$true] %s26_s14 }
   0x2   :  { %10 = vsyncpa [#allocation4], 0  ;;  %s264_s15 = smov [#allocation5]   ;;  %s16_s19 = sshll.u32 %s302_s0, 4  ;;  %s17_s19 = int_to_ptr.hbm [resolvable:$true] %s16_s19 }
   0x3   :  { %s28_s16 = sshll.u32 %s264_s15, 4  ;;  %s265_s20 = smov 256   ;;  %s29_s16 = int_to_ptr.vmem [resolvable:$true] %s28_s16 }
   0x4   :  { %s266_s21 = smov 16   ;;  %s267_s22 = smov [#allocation2]  }
   0x5   :  { %34 = dma.hbm_to_vmem [thread:$0]  %s27_s14, 2048, %s29_s16, [#allocation6], %s265_s20, %s265_s20, %s266_s21  }
   0x6   :  { %s18_s23 = sshll.u32 %s267_s22, 4  ;;  %s40_s26 = sshll.u32 %s304_s2, 4  ;;  %s19_s23 = int_to_ptr.vmem [resolvable:$true] %s18_s23  ;;  %s41_s26 = int_to_ptr.hbm [resolvable:$true] %s40_s26 }
   0x7   :  { %21 = dma.hbm_to_vmem [thread:$0]  %s17_s19, 16, %s19_s23, [#allocation3]  }
   0x8   :  { %s268_s1 = smov [#allocation7]  }
   0x9   :  { %s42_s27 = sshll.u32 %s268_s1, 4  ;;  %s43_s27 = int_to_ptr.vmem [resolvable:$true] %s42_s27 }
   0xa   :  { %45 = dma.hbm_to_vmem [thread:$0]  %s41_s26, 32, %s43_s27, [#allocation6]  }
   0xb   :  { %258 = dma.done.wait [#allocation3], 16  }
   0xc   :  { %259 = vsyncadd [#allocation3], 4294967280 }
   0xd   :  { %260 = dma.done.wait [#allocation6], 2080  }
   0xe   :  { %261 = vsyncadd [#allocation6], 4294965216  ;;  %v74_v0 = vld [vmem:[#allocation5 + $0x78] sm:$0xff]  ;;  %v73_v1 = vld [vmem:[#allocation5 + $0x70] sm:$0xff]  ;;  %vm81_vm0 = vcmask 523264   ;;  %v131_v20 = vlaneseq  ;;  %s269_s0 = smov [#allocation8]  }
   0xf   :  { %v72_v2 = vld [vmem:[#allocation5 + $0x68] sm:$0xff]  ;;  %113 = vmatpush.msra.mxu1 %v74_v0  ;;  %93 = vmatpush.msra.mxu0 %v73_v1  ;;  %v71_v3 = vld [vmem:[#allocation5 + $0x60] sm:$0xff]  ;;  %v70_v4 = vld [vmem:[#allocation5 + $0x58] sm:$0xff]  ;;  %s141_s2 = sshll.u32 %s269_s0, 4  ;;  %s143_s30 = sshll.u32 %s305_s3, 4  ;;  %vm128_vm1 = vcmask 1040384   ;;  %s142_s2 = int_to_ptr.vmem [resolvable:$true] %s141_s2  ;;  %s144_s30 = int_to_ptr.hbm [resolvable:$true] %s143_s30 }
  0x10   :  { %v69_v5 = vld [vmem:[#allocation5 + $0x50] sm:$0xff]  ;;  %v68_v6 = vld [vmem:[#allocation5 + $0x48] sm:$0xff]  ;;  %v67_v7 = vld [vmem:[#allocation5 + $0x40] sm:$0xff]  ;;  %vm133_vm2 = vcmp.lt.s32.totalorder %v131_v20, 256 }
  0x11   :  { %114 = vmatpush.msra.mxu1 %v72_v2  ;;  %94 = vmatpush.msra.mxu0 %v71_v3  ;;  %v66_v8 = vld [vmem:[#allocation5 + $0x38] sm:$0xff]  ;;  %v65_v9 = vld [vmem:[#allocation5 + $0x30] sm:$0xff]  ;;  %v64_v10 = vld [vmem:[#allocation5 + $0x28] sm:$0xff] }
  0x12   :  { %v63_v11 = vld [vmem:[#allocation5 + $0x20] sm:$0xff]  ;;  %v62_v12 = vld [vmem:[#allocation5 + $0x18] sm:$0xff]  ;;  %v61_v13 = vld [vmem:[#allocation5 + $0x10] sm:$0xff] }
  0x13   :  { %115 = vmatpush.msra.mxu1 %v70_v4  ;;  %95 = vmatpush.msra.mxu0 %v69_v5  ;;  %v60_v14 = vld [vmem:[#allocation5 + $0x8] sm:$0xff]  ;;  %v59_v15 = vld [vmem:[#allocation5] sm:$0xff]  ;;  %v58_v16 = vld [vmem:[#allocation2] sm:$0x1] }
  0x14   :  { %v75_v17 = vld [vmem:[#allocation7] sm:$0x3] }
  0x15   :  { %116 = vmatpush.msra.mxu1 %v68_v6  ;;  %96 = vmatpush.msra.mxu0 %v67_v7  ;;  %v78_v18 = vperm.slane %v75_v17, 1  ;;  %v77_v19 = vperm.slane %v75_v17, 0 }
  0x17   :  { %117 = vmatpush.msra.mxu1 %v66_v8  ;;  %97 = vmatpush.msra.mxu0 %v65_v9 }
  0x19   :  { %118 = vmatpush.msra.mxu1 %v64_v10  ;;  %98 = vmatpush.msra.mxu0 %v63_v11 }
  0x1b   :  { %119 = vmatpush.msra.mxu1 %v62_v12  ;;  %99 = vmatpush.msra.mxu0 %v61_v13 }
  0x1d   :  { %120 = vmatpush.msra.mxu1 %v60_v14  ;;  %100 = vmatpush.msra.mxu0 %v59_v15 }
  0x1e   :  { %155 = vmatmul.msk.f32.vlgmr.msra.gmra.mxu1 %vm81_vm0, %v58_v16  ;;  %154 = vmatmul.msk.f32.vlgmr.msra.gmra.mxu0 %vm81_vm0, %v58_v16 }
  0x9b   :  { %v122_v21 = vpop.f32.mrf.mxu1  ;;  %v102_v22 = vpop.f32.mrf.mxu0 }
  0x9c   :  { %v123_v23 = vadd.f32 %v122_v21, %v78_v18  ;;  %v103_v24 = vadd.f32 %v102_v22, %v77_v19 }
  0x9e   :  { %v127_v25 = vrot.slane %v123_v23, 7 }
  0xa0   :  { %v129_v26 = vsel %vm128_vm1, %v103_v24, %v127_v25 }
  0xa1   :  { %135 = vst.msk [vmem:[#allocation8] sm:$0x3] %vm133_vm2, %v129_v26 }
  0xa2   :  { %146 = dma.vmem_to_hbm [thread:$0]  %s142_s2, 32, %s144_s30, [#allocation4]  }
  0xa3   :  { %262 = dma.done.wait [#allocation4], 32  }
  0xa4   :  { %263 = vsyncadd [#allocation4], 4294967264 }
  0xa5   :  { %151 = vsyncpa [#allocation3], 1 }
  0xa6   :  { %152 = vsyncpa [#allocation6], 1 }
  0xa7   :  { %153 = vsyncpa [#allocation4], 1 }

</bundles_post_ra>
